<compile_context>
chip_gen: v6e
topology: v6e:2x2x1
jax: 0.10.0
libtpu: 0.0.40
codegen_flags: <defaults>
</compile_context>

<pallas_src>
import functools

import jax
import jax.numpy as jnp
from jax.experimental import pallas as pl
from jax.experimental.pallas import tpu as pltpu

KH = 3  # stem conv taps (height)
KW = 3  # stem conv taps (width)


def _stem_conv_kernel(x_ref, wt_ref, b_ref, o_ref):
    # x_ref:  (1, 1, TILE_H, CK)    rows for (n, w-tile, h-tile); CK = KH*(TILE_W+2)*Cin
    # wt_ref: (CK, NCOL)            block-Toeplitz weights (resident, single-buffered)
    # b_ref:  (1, NCOL)             o-major bias, f32 (resident, single-buffered)
    # o_ref:  (1, 1, TILE_H, NCOL)  output tile; NCOL = Cout*TILE_W (multiple of 128)
    acc = jnp.dot(x_ref[0, 0], wt_ref[...], preferred_element_type=jnp.float32)
    acc = jnp.maximum(acc + b_ref[...], 0.0)     # bias broadcast + ReLU in f32
    o_ref[0, 0] = acc.astype(o_ref.dtype)        # unmasked, lane-dense store


def build_stem_params(w, b, *, tile_w, compute_dtype=jnp.bfloat16):
    """Fold the 3x3 stem conv into block-Toeplitz matmul weights.  Built ONCE,
    outside the per-call path.  Columns are o-major (Cout outer, TILE_W inner)
    so the final NCHW conversion is a cheap axis swap."""
    kh, kw, cin, cout = w.shape
    wpt = tile_w + 2
    kw_idx = jnp.arange(kw)[:, None, None]
    p_idx = jnp.arange(wpt)[None, :, None]
    w_idx = jnp.arange(tile_w)[None, None, :]
    sel = (p_idx == w_idx + kw_idx).astype(w.dtype)            # (KW, TILE_W+2, TILE_W)
    wt = jnp.einsum("kpw,hkco->hpcow", sel, w)                 # (KH, Wpt, Cin, Cout, TW)
    wt = wt.reshape(kh * wpt * cin, cout * tile_w).astype(compute_dtype)
    b_tiled = jnp.repeat(b.astype(jnp.float32), tile_w).reshape(1, cout * tile_w)
    return wt, b_tiled


@functools.partial(jax.jit, static_argnames=("tile_h", "tile_w"))
def api_net_gradcam_forward(images, wt, b_tiled, *, tile_h=None, tile_w=None):
    """images: (N, Cin, H, W) NCHW.  wt/b_tiled from build_stem_params(tile_w=...).
    Returns conv_out in NCHW (f32).  The module's pool_out is dead code in
    forward() and intentionally not computed."""
    N, Cin, H, W = images.shape
    tile_h = H if tile_h is None else tile_h
    tile_w = W if tile_w is None else tile_w
    assert H % tile_h == 0 and W % tile_w == 0
    # tile_h must be H or a multiple of 8 (use a multiple of 16 for bf16 inputs).
    assert tile_h == H or tile_h % 8 == 0
    n_ht = H // tile_h
    n_wt = W // tile_w
    wpt = tile_w + 2
    ck = KH * wpt * Cin
    assert wt.shape[0] == ck, "weights built with a different tile_w / Cin"
    ncol = wt.shape[1]
    cout = ncol // tile_w
    # lane-dense-store guard: unmasked vst needs a multiple of 128 lanes.
    assert ncol % 128 == 0, "Cout * tile_w must be a multiple of 128"
    compute_dtype = wt.dtype

    # --- input prep (fused inside this jit): NCHW -> NHWC -> pad -> overlapping
    #     per-W-tile column windows -> fold the 3 KH taps into the lane dim.
    x = jnp.transpose(images, (0, 2, 3, 1))                    # (N, H, W, Cin)
    xp = jnp.pad(x, ((0, 0), (1, 1), (1, 1), (0, 0)))          # (N, H+2, W+2, Cin)
    wins = jnp.stack(
        [xp[:, :, i * tile_w:i * tile_w + wpt, :] for i in range(n_wt)], axis=1
    ).reshape(N, n_wt, H + 2, wpt * Cin)                       # (N, n_wt, H+2, Wpt*Cin)
    x_cat = jnp.concatenate(
        [wins[:, :, kh:kh + H, :] for kh in range(KH)], axis=-1
    ).astype(compute_dtype)                                    # (N, n_wt, H, CK)

    conv_slab = pl.pallas_call(
        _stem_conv_kernel,
        out_shape=jax.ShapeDtypeStruct((N, n_wt, H, ncol), jnp.float32),
        grid_spec=pltpu.PrefetchScalarGridSpec(
            num_scalar_prefetch=0,
            grid=(N, n_wt, n_ht),
            in_specs=[
                pl.BlockSpec((1, 1, tile_h, ck), lambda n, wi, ti: (n, wi, ti, 0)),
                pl.BlockSpec((ck, ncol), lambda n, wi, ti: (0, 0),
                             pipeline_mode=pl.Buffered(1)),     # resident weights
                pl.BlockSpec((1, ncol), lambda n, wi, ti: (0, 0),
                             pipeline_mode=pl.Buffered(1)),     # resident bias
            ],
            out_specs=pl.BlockSpec((1, 1, tile_h, ncol),
                                   lambda n, wi, ti: (n, wi, ti, 0)),
        ),
        compiler_params=pltpu.CompilerParams(
            dimension_semantics=("parallel", "parallel", "parallel"),
            vmem_limit_bytes=32 * 1024 * 1024,
        ),
    )(x_cat, wt, b_tiled)

    # o-major columns -> only a non-minor axis swap remains; lanes (tile_w) stay minor.
    conv_out = conv_slab.reshape(N, n_wt, H, cout, tile_w)
    conv_out = conv_out.transpose(0, 3, 2, 1, 4).reshape(N, cout, H, W)
    return conv_out


if __name__ == "__main__":
    key = jax.random.PRNGKey(0)
    k_img, k_w, k_b = jax.random.split(key, 3)

    N, Cin, H, W = 2, 4, 16, 16        # small synthetic shapes
    Cout = 32                          # stand-in for the backbone feature width (fc_size)

    images = jax.random.normal(k_img, (N, Cin, H, W), dtype=jnp.float32)
    w = 0.1 * jax.random.normal(k_w, (KH, KW, Cin, Cout), dtype=jnp.float32)
    b = 0.01 * jax.random.normal(k_b, (Cout,), dtype=jnp.float32)

    # pure-JAX reference: SAME 3x3 conv + bias + ReLU
    ref = jax.lax.conv_general_dilated(
        images, jnp.transpose(w, (3, 2, 0, 1)),
        window_strides=(1, 1), padding="SAME",
        dimension_numbers=("NCHW", "OIHW", "NCHW"))
    ref = jnp.maximum(ref + b[None, :, None, None], 0.0)

    # default path: bf16 compute, full-H / full-W tiles, grid = (N, 1, 1)
    wt_bf16, b_t = build_stem_params(w, b, tile_w=W)           # bf16 default
    out_bf16 = jax.block_until_ready(api_net_gradcam_forward(images, wt_bf16, b_t))
    assert out_bf16.shape == (N, Cout, H, W)
    assert float(jnp.max(jnp.abs(out_bf16 - ref))) < 1e-1

    # f32 path: strict numerics
    wt_f32, b_t32 = build_stem_params(w, b, tile_w=W, compute_dtype=jnp.float32)
    out_f32 = jax.block_until_ready(api_net_gradcam_forward(images, wt_f32, b_t32))
    assert float(jnp.max(jnp.abs(out_f32 - ref))) < 1e-4

    # W-tiled path (bounds the resident weight block at real backbone widths, v7x)
    wt_tiled, b_tiled = build_stem_params(w, b, tile_w=8, compute_dtype=jnp.float32)
    out_tiled = jax.block_until_ready(
        api_net_gradcam_forward(images, wt_tiled, b_tiled, tile_h=8, tile_w=8))
    assert float(jnp.max(jnp.abs(out_tiled - ref))) < 1e-4

    print("KERNEL_OK")
</pallas_src>

<mosaic_0001>
module attributes {stable_mosaic.version = 11 : i64} {
  func.func @_stem_conv_kernel(%arg0: i32, %arg1: i32, %arg2: i32, %arg3: memref<1x1x16x216xbf16, #tpu.memory_space<vmem>>, %arg4: memref<216x512xbf16, #tpu.memory_space<vmem>>, %arg5: memref<1x512xf32, #tpu.memory_space<vmem>>, %arg6: memref<1x1x16x512xf32, #tpu.memory_space<vmem>>) attributes {dimension_semantics = [#tpu.dimension_semantics<parallel>, #tpu.dimension_semantics<parallel>, #tpu.dimension_semantics<parallel>], iteration_bounds = array<i64: 2, 1, 1>, scalar_prefetch = 0 : i64, scratch_operands = 0 : i64, tpu.core_type = #tpu.core_type<tc>, window_params = [{transform_indices = @transform_0, window_bounds = array<i64: 1, 1, 16, 216>}, {pipeline_mode = #tpu.pipeline_mode<synchronous>, transform_indices = @transform_1, window_bounds = array<i64: 216, 512>}, {pipeline_mode = #tpu.pipeline_mode<synchronous>, transform_indices = @transform_2, window_bounds = array<i64: 1, 512>}, {transform_indices = @transform_3, window_bounds = array<i64: 1, 1, 16, 512>}]} {
    %c0 = arith.constant 0 : index
    %c0_0 = arith.constant 0 : index
    %c0_1 = arith.constant 0 : index
    %c0_2 = arith.constant 0 : index
    %0 = vector.load %arg3[%c0, %c0_0, %c0_1, %c0_2] : memref<1x1x16x216xbf16, #tpu.memory_space<vmem>>, vector<1x1x16x216xbf16>
    %1 = vector.shape_cast %0 : vector<1x1x16x216xbf16> to vector<16x216xbf16>
    %c0_3 = arith.constant 0 : index
    %c0_4 = arith.constant 0 : index
    %2 = vector.load %arg4[%c0_3, %c0_4] : memref<216x512xbf16, #tpu.memory_space<vmem>>, vector<216x512xbf16>
    %cst = arith.constant dense<0.000000e+00> : vector<16x512xf32>
    %3 = tpu.matmul %1, %2, %cst {dimension_numbers = #tpu.dot_dimension_numbers<[1], [0], [0], [1], [0, 0, 1, 1], [], []>} : vector<16x216xbf16>, vector<216x512xbf16>, vector<16x512xf32> -> vector<16x512xf32>
    %c0_5 = arith.constant 0 : index
    %c0_6 = arith.constant 0 : index
    %4 = vector.load %arg5[%c0_5, %c0_6] : memref<1x512xf32, #tpu.memory_space<vmem>>, vector<1x512xf32>
    %5 = vector.broadcast %4 : vector<1x512xf32> to vector<16x512xf32>
    %6 = arith.addf %3, %5 : vector<16x512xf32>
    %cst_7 = arith.constant 0.000000e+00 : f32
    %7 = vector.broadcast %cst_7 : f32 to vector<16x512xf32>
    %8 = arith.maximumf %6, %7 : vector<16x512xf32>
    %c0_8 = arith.constant 0 : index
    %c0_9 = arith.constant 0 : index
    %c0_10 = arith.constant 0 : index
    %c0_11 = arith.constant 0 : index
    %9 = vector.load %arg6[%c0_8, %c0_9, %c0_10, %c0_11] : memref<1x1x16x512xf32, #tpu.memory_space<vmem>>, vector<1x1x16x512xf32>
    %10 = vector.shape_cast %9 : vector<1x1x16x512xf32> to vector<16x512xf32>
    %11 = vector.shape_cast %8 : vector<16x512xf32> to vector<1x1x16x512xf32>
    tpu.vector_store %arg6[%c0_8, %c0_9, %c0_10, %c0_11], %11 {strides = array<i32>} : memref<1x1x16x512xf32, #tpu.memory_space<vmem>>, vector<1x1x16x512xf32>,
    return
  }
  func.func @transform_0(%arg0: i32, %arg1: i32, %arg2: i32) -> (i32, i32, i32, i32) {
    %c0_i32 = arith.constant 0 : i32
    %c0_i32_0 = arith.constant 0 : i32
    return %arg0, %arg1, %arg2, %c0_i32 : i32, i32, i32, i32
  }
  func.func @transform_1(%arg0: i32, %arg1: i32, %arg2: i32) -> (i32, i32) {
    %c0_i32 = arith.constant 0 : i32
    %c0_i32_0 = arith.constant 0 : i32
    %c0_i32_1 = arith.constant 0 : i32
    return %c0_i32, %c0_i32_0 : i32, i32
  }
  func.func @transform_2(%arg0: i32, %arg1: i32, %arg2: i32) -> (i32, i32) {
    %c0_i32 = arith.constant 0 : i32
    %c0_i32_0 = arith.constant 0 : i32
    %c0_i32_1 = arith.constant 0 : i32
    return %c0_i32, %c0_i32_0 : i32, i32
  }
  func.func @transform_3(%arg0: i32, %arg1: i32, %arg2: i32) -> (i32, i32, i32, i32) {
    %c0_i32 = arith.constant 0 : i32
    %c0_i32_0 = arith.constant 0 : i32
    return %arg0, %arg1, %arg2, %c0_i32 : i32, i32, i32, i32
  }
}

</mosaic_0001>

<bundles_post_ra>
// kernel: api_net_gradcam_forward.1
= control target key start
LH: loop header
LB: loop body
LE: loop exit
PB: predicated region body
PF: predicated region fallthrough
CT: control target
= control target key end

     0   :  { %s1072_s12 = smov 0   ;;  %s1074_s13 = smov 0   ;;  %s1282_s0 = inlined_call_operand.vmem [shape: bf16[2,1,16,216], index: 0, kind: input, shape index: {}]   ;;  %s1283_s1 = inlined_call_operand.vmem [shape: bf16[216,512], index: 1, kind: input, shape index: {}]   ;;  %s1284_s2 = inlined_call_operand.vmem [shape: f32[1,512], index: 2, kind: input, shape index: {}]   ;;  %s1285_s3 = inlined_call_operand.vmem [shape: f32[2,1,16,512], index: 3, kind: output, shape index: {}]  }
   0x1   :  { %s1076_s14 = smov 0  }
   0x2 LB: > { %s32_s15 = sadd.s32 1, %s1046_s13  ;;  %p848_p0 = scmp.ge.s32.totalorder %s1050_s14, 1  ;;  %s1050_s14 = sphi %s1076_s14, %s13_s14   ;;  %s1046_s13 = sphi %s1074_s13, %s1287_s13   ;;  %s1042_s12 = sphi %s1072_s12, %s1286_s12  }
   0x3   : > { %p34_p1 = scmp.ge.s32.totalorder %s32_s15, 2  ;;  %p174_p2 = scmp.lt.s32.totalorder %s1050_s14, 3 }
   0x5   : > { %s1289_s15 = smov (%p34_p1, %s32_s15), 0  ;;  %p175_p3 = pnand %p848_p0, %p174_p2 }
   0x6   : > { %p217_p4 = scmp.lt.s32.totalorder (!%p175_p3), %s1042_s12, 1 }
   0x7   : > { %178 = sbr.rel (%p175_p3) target bundleno = 273 (0x111), region = 32 }
   0xc   : > { %v943_v0 = vld [vmem:[%s1283_s1 + $0xe4] ss:$16 sps:$4 sm:$0xff]   ;;  %v945_v1 = vld [vmem:[%s1283_s1 + $0xec] ss:$16 sps:$4 sm:$0xff]   ;;  %v947_v2 = vld [vmem:[%s1283_s1 + $0xe0] ss:$16 sps:$4 sm:$0xff]   ;;  %v305_v62 = vlaneseq }
   0xd   : > { %621 = vmatprep.subr.bf16.mxu0 %v943_v0  ;;  %v948_v3 = vld [vmem:[%s1283_s1 + $0xe8] ss:$16 sps:$4 sm:$0xff]   ;;  %664 = vmatprep.subr.bf16.mxu1 %v945_v1  ;;  %v949_v4 = vld [vmem:[%s1283_s1 + $0xc4] ss:$16 sps:$4 sm:$0xff]   ;;  %v951_v5 = vld [vmem:[%s1283_s1 + $0xcc] ss:$16 sps:$4 sm:$0xff]  }
   0xe   : > { %622 = vmatpush1.bf16.msra.mxu0 %v947_v2  ;;  %665 = vmatpush1.bf16.msra.mxu1 %v948_v3  ;;  %v953_v6 = vld [vmem:[%s1283_s1 + $0xc0] ss:$16 sps:$4 sm:$0xff]   ;;  %v954_v7 = vld [vmem:[%s1283_s1 + $0xc8] ss:$16 sps:$4 sm:$0xff]   ;;  %v955_v8 = vld [vmem:[%s1283_s1 + $0xa4] ss:$16 sps:$4 sm:$0xff]  }
   0xf   : > { %623 = vmatprep.subr.bf16.mxu0 %v949_v4  ;;  %666 = vmatprep.subr.bf16.mxu1 %v951_v5  ;;  %v957_v9 = vld [vmem:[%s1283_s1 + $0xac] ss:$16 sps:$4 sm:$0xff]   ;;  %v959_v10 = vld [vmem:[%s1283_s1 + $0xa0] ss:$16 sps:$4 sm:$0xff]   ;;  %v960_v11 = vld [vmem:[%s1283_s1 + $0xa8] ss:$16 sps:$4 sm:$0xff]  }
  0x10   : > { %v961_v12 = vld [vmem:[%s1283_s1 + $0x84] ss:$16 sps:$4 sm:$0xff]   ;;  %v963_v13 = vld [vmem:[%s1283_s1 + $0x8c] ss:$16 sps:$4 sm:$0xff]   ;;  %v965_v14 = vld [vmem:[%s1283_s1 + $0x80] ss:$16 sps:$4 sm:$0xff]  }
  0x11   : > { %v966_v15 = vld [vmem:[%s1283_s1 + $0x88] ss:$16 sps:$4 sm:$0xff]   ;;  %v967_v16 = vld [vmem:[%s1283_s1 + $0x64] ss:$16 sps:$4 sm:$0xff]   ;;  %v969_v17 = vld [vmem:[%s1283_s1 + $0x6c] ss:$16 sps:$4 sm:$0xff]  }
  0x12   : > { %624 = vmatpush1.bf16.msra.mxu0 %v953_v6  ;;  %667 = vmatpush1.bf16.msra.mxu1 %v954_v7  ;;  %v971_v18 = vld [vmem:[%s1283_s1 + $0x60] ss:$16 sps:$4 sm:$0xff]   ;;  %v972_v19 = vld [vmem:[%s1283_s1 + $0x68] ss:$16 sps:$4 sm:$0xff]   ;;  %v973_v20 = vld [vmem:[%s1283_s1 + $0x44] ss:$16 sps:$4 sm:$0xff]  }
  0x13   : > { %625 = vmatprep.subr.bf16.mxu0 %v955_v8  ;;  %668 = vmatprep.subr.bf16.mxu1 %v957_v9  ;;  %v975_v21 = vld [vmem:[%s1283_s1 + $0x4c] ss:$16 sps:$4 sm:$0xff]   ;;  %v977_v22 = vld [vmem:[%s1283_s1 + $0x40] ss:$16 sps:$4 sm:$0xff]   ;;  %v978_v23 = vld [vmem:[%s1283_s1 + $0x48] ss:$16 sps:$4 sm:$0xff]  }
  0x14   : > { %v979_v24 = vld [vmem:[%s1283_s1 + $0x24] ss:$16 sps:$4 sm:$0xff]   ;;  %v981_v25 = vld [vmem:[%s1283_s1 + $0x2c] ss:$16 sps:$4 sm:$0xff]   ;;  %v983_v26 = vld [vmem:[%s1283_s1 + $0x20] ss:$16 sps:$4 sm:$0xff]  }
  0x15   : > { %v984_v27 = vld [vmem:[%s1283_s1 + $0x28] ss:$16 sps:$4 sm:$0xff]   ;;  %v985_v28 = vld [vmem:[%s1283_s1 + $0x4] ss:$16 sps:$4 sm:$0xff]   ;;  %v987_v29 = vld [vmem:[%s1283_s1 + $0xc] ss:$16 sps:$4 sm:$0xff]  }
  0x16   : > { %626 = vmatpush1.bf16.msra.mxu0 %v959_v10  ;;  %669 = vmatpush1.bf16.msra.mxu1 %v960_v11  ;;  %v301_v30 = vld [vmem:[%s1283_s1 + $0x1a0] sm:$0xff]  ;;  %v302_v31 = vld [vmem:[%s1283_s1 + $0x1a8] sm:$0xff]  ;;  %s1291_s12 = smov (!%p217_p4, %s1042_s12), 1  ;;  %vm608_vm0 = vcmask 1043456   ;;  %vm604_vm1 = vcmask 719872   ;;  %v306_v63 = vshrl.u32 %v305_v62, 7 }
  0x17   : > { %627 = vmatprep.subr.bf16.mxu0 %v961_v12  ;;  %670 = vmatprep.subr.bf16.mxu1 %v963_v13  ;;  %v989_v32 = vld [vmem:[%s1283_s1] ss:$16 sps:$4 sm:$0xff]   ;;  %v990_v33 = vld [vmem:[%s1283_s1 + $0x8] ss:$16 sps:$4 sm:$0xff]   ;;  %v908_v34 = vcombine.high %v301_v30, %v301_v30  ;;  %v910_v35 = vcombine.high %v302_v31, %v302_v31  ;;  %v907_v36 = vcombine.low %v301_v30, %v301_v30  ;;  %s917_s11 = sshll.u32 %s1291_s12, 4  ;;  %s918_s16 = sshll.u32 %s1291_s12, 6 }
  0x18   : > { %v909_v37 = vcombine.low %v302_v31, %v302_v31  ;;  %v995_v38 = vld [vmem:[%s1283_s1 + $0x184] ss:$16 sps:$4 sm:$0xff]   ;;  %v997_v41 = vld [vmem:[%s1283_s1 + $0x18c] ss:$16 sps:$4 sm:$0xff]   ;;  %s1208_s22 = scalar_lea.vmem %s1282_s0, %s917_s11  ;;  %v999_v42 = vld [vmem:[%s1283_s1 + $0x180] ss:$16 sps:$4 sm:$0xff]   ;;  %s244_s18 = scalar_lea.vmem %s1285_s3, %s918_s16 }
  0x19   : > { %v610_v39 = vsel %vm608_vm0, %v907_v36, 0  ;;  %v1000_v43 = vld [vmem:[%s1283_s1 + $0x188] ss:$16 sps:$4 sm:$0xff]   ;;  %v1027_v44 = vld [vmem:[%s1208_s22 + $0x4] ss:$8 sps:$4 sm:$0xff]   ;;  %v307_v0 = vsub.s32 0, %v306_v63 }
  0x1a   : > { %628 = vmatpush1.bf16.msra.mxu0 %v965_v14  ;;  %671 = vmatpush1.bf16.msra.mxu1 %v966_v15  ;;  %v616_v40 = vsel %vm608_vm0, %v909_v37, 0  ;;  %v1001_v45 = vld [vmem:[%s1283_s1 + $0x164] ss:$16 sps:$4 sm:$0xff]   ;;  %v1003_v46 = vld [vmem:[%s1283_s1 + $0x16c] ss:$16 sps:$4 sm:$0xff]   ;;  %v315_v1 = vsub.s32 2, %v306_v63 }
  0x1b   : > { %629 = vmatprep.subr.bf16.mxu0 %v967_v16  ;;  %672 = vmatprep.subr.bf16.mxu1 %v969_v17  ;;  %v1005_v47 = vld [vmem:[%s1283_s1 + $0x160] ss:$16 sps:$4 sm:$0xff]   ;;  %v1006_v48 = vld [vmem:[%s1283_s1 + $0x168] ss:$16 sps:$4 sm:$0xff]   ;;  %v1007_v49 = vld [vmem:[%s1283_s1 + $0x144] ss:$16 sps:$4 sm:$0xff]  }
  0x1c   : > { %912 = vmatprep.mubr.msk.bf16.mxu0 %vm604_vm1, %v1027_v44  ;;  %914 = vmatprep.mubr.msk.bf16.mxu1 %vm604_vm1, %v1027_v44  ;;  %v1009_v50 = vld [vmem:[%s1283_s1 + $0x14c] ss:$16 sps:$4 sm:$0xff]   ;;  %v1011_v51 = vld [vmem:[%s1283_s1 + $0x140] ss:$16 sps:$4 sm:$0xff]   ;;  %v1012_v52 = vld [vmem:[%s1283_s1 + $0x148] ss:$16 sps:$4 sm:$0xff]  }
  0x1d   : > { %v1013_v53 = vld [vmem:[%s1283_s1 + $0x124] ss:$16 sps:$4 sm:$0xff]   ;;  %v1015_v54 = vld [vmem:[%s1283_s1 + $0x12c] ss:$16 sps:$4 sm:$0xff]   ;;  %v1017_v55 = vld [vmem:[%s1283_s1 + $0x120] ss:$16 sps:$4 sm:$0xff]  }
  0x1e   : > { %630 = vmatpush1.bf16.msra.mxu0 %v971_v18  ;;  %673 = vmatpush1.bf16.msra.mxu1 %v972_v19  ;;  %v1018_v56 = vld [vmem:[%s1283_s1 + $0x128] ss:$16 sps:$4 sm:$0xff]   ;;  %v1019_v57 = vld [vmem:[%s1283_s1 + $0x104] ss:$16 sps:$4 sm:$0xff]   ;;  %v1021_v58 = vld [vmem:[%s1283_s1 + $0x10c] ss:$16 sps:$4 sm:$0xff]  }
  0x1f   : > { %631 = vmatprep.subr.bf16.mxu0 %v973_v20  ;;  %674 = vmatprep.subr.bf16.mxu1 %v975_v21  ;;  %v1023_v59 = vld [vmem:[%s1283_s1 + $0x100] ss:$16 sps:$4 sm:$0xff]   ;;  %v1024_v60 = vld [vmem:[%s1283_s1 + $0x108] ss:$16 sps:$4 sm:$0xff]   ;;  %v311_v3 = vsub.s32 1, %v306_v63  ;;  %v319_v4 = vsub.s32 3, %v306_v63 }
  0x20   : > { %v1025_v61 = vld [vmem:[%s1208_s22] ss:$8 sps:$4 sm:$0xff]  }
  0x21   : > { %v303_v2 = vld [vmem:[%s1284_s2] sm:$0xf] }
  0x22   : > { %632 = vmatpush1.bf16.msra.mxu0 %v977_v22  ;;  %675 = vmatpush1.bf16.msra.mxu1 %v978_v23  ;;  %v308_v5 = vrot.slane %v303_v2, %v307_v0  ;;  %v316_v6 = vrot.slane %v303_v2, %v315_v1  ;;  %v312_v7 = vrot.slane %v303_v2, %v311_v3 }
  0x23   : > { %633 = vmatprep.subr.bf16.mxu0 %v979_v24  ;;  %676 = vmatprep.subr.bf16.mxu1 %v981_v25  ;;  %v320_v8 = vrot.slane %v303_v2, %v319_v4 }
  0x26   : > { %634 = vmatpush1.bf16.msra.mxu0 %v983_v26  ;;  %677 = vmatpush1.bf16.msra.mxu1 %v984_v27 }
  0x27   : > { %635 = vmatprep.subr.bf16.mxu0 %v985_v28  ;;  %678 = vmatprep.subr.bf16.mxu1 %v987_v29 }
  0x2a   : > { %636 = vmatpush1.bf16.msra.mxu0 %v989_v32  ;;  %679 = vmatpush1.bf16.msra.mxu1 %v990_v33 }
  0x2b   : > { %911 = vmatprep.subr.msk.bf16.mxu0 %vm608_vm0, %v908_v34  ;;  %913 = vmatprep.subr.msk.bf16.mxu1 %vm608_vm0, %v910_v35 }
  0x2e   : > { %642 = vmatpush2.bf16.msra.mxu0 %v610_v39  ;;  %685 = vmatpush2.bf16.msra.mxu1 %v616_v40 }
  0x2f   : > { %643 = vmatprep.subr.bf16.mxu0 %v995_v38  ;;  %686 = vmatprep.subr.bf16.mxu1 %v997_v41 }
  0x32   : > { %644 = vmatpush2.bf16.msra.mxu0 %v999_v42  ;;  %687 = vmatpush2.bf16.msra.mxu1 %v1000_v43 }
  0x33   : > { %645 = vmatprep.subr.bf16.mxu0 %v1001_v45  ;;  %688 = vmatprep.subr.bf16.mxu1 %v1003_v46 }
  0x36   : > { %646 = vmatpush2.bf16.msra.mxu0 %v1005_v47  ;;  %689 = vmatpush2.bf16.msra.mxu1 %v1006_v48 }
  0x37   : > { %647 = vmatprep.subr.bf16.mxu0 %v1007_v49  ;;  %690 = vmatprep.subr.bf16.mxu1 %v1009_v50 }
  0x3a   : > { %648 = vmatpush2.bf16.msra.mxu0 %v1011_v51  ;;  %691 = vmatpush2.bf16.msra.mxu1 %v1012_v52 }
  0x3b   : > { %649 = vmatprep.subr.bf16.mxu0 %v1013_v53  ;;  %692 = vmatprep.subr.bf16.mxu1 %v1015_v54 }
  0x3e   : > { %650 = vmatpush2.bf16.msra.mxu0 %v1017_v55  ;;  %693 = vmatpush2.bf16.msra.mxu1 %v1018_v56 }
  0x3f   : > { %651 = vmatprep.subr.bf16.mxu0 %v1019_v57  ;;  %694 = vmatprep.subr.bf16.mxu1 %v1021_v58 }
  0x42   : > { %652 = vmatpush2.bf16.msra.mxu0 %v1023_v59  ;;  %695 = vmatpush2.bf16.msra.mxu1 %v1024_v60 }
  0x45   : > { %654 = vmatmul.mubr.bf16.vlgmr.msra.gmra.mxu0 %v1025_v61  ;;  %697 = vmatmul.mubr.bf16.vlgmr.msra.gmra.mxu1 %v1025_v61 }
 0x105   : > { %v655_v9 = vpop.f32.mrf.mxu0  ;;  %v698_v10 = vpop.f32.mrf.mxu1 }
 0x106   : > { %v656_v11 = vadd.f32 %v655_v9, %v308_v5  ;;  %v699_v12 = vadd.f32 %v698_v10, %v316_v6 }
 0x107   : > { %v657_v13 = vpop.f32.mrf.mxu0  ;;  %v700_v14 = vpop.f32.mrf.mxu1 }
 0x108   : > { %v707_v15 = vmax.f32 %v656_v11, 0.0  ;;  %v709_v16 = vmax.f32 %v699_v12, 0.0  ;;  %v658_v17 = vadd.f32 %v657_v13, %v312_v7  ;;  %v701_v18 = vadd.f32 %v700_v14, %v320_v8 }
 0x109   : > { %v659_v19 = vpop.f32.mrf.mxu0  ;;  %v702_v20 = vpop.f32.mrf.mxu1 }
 0x10a   : > { %715 = vst [vmem:[%s244_s18] sm:$0xff] %v707_v15  ;;  %717 = vst [vmem:[%s244_s18 + $0x10] sm:$0xff] %v709_v16  ;;  %v708_v21 = vmax.f32 %v658_v17, 0.0  ;;  %v710_v22 = vmax.f32 %v701_v18, 0.0  ;;  %v660_v23 = vadd.f32 %v659_v19, %v308_v5  ;;  %v703_v24 = vadd.f32 %v702_v20, %v316_v6 }
 0x10b   : > { %v661_v25 = vpop.f32.mrf.mxu0  ;;  %v704_v26 = vpop.f32.mrf.mxu1 }
 0x10c   : > { %716 = vst [vmem:[%s244_s18 + $0x8] sm:$0xff] %v708_v21  ;;  %718 = vst [vmem:[%s244_s18 + $0x18] sm:$0xff] %v710_v22  ;;  %v711_v27 = vmax.f32 %v660_v23, 0.0  ;;  %v713_v28 = vmax.f32 %v703_v24, 0.0  ;;  %v662_v29 = vadd.f32 %v661_v25, %v312_v7  ;;  %v705_v30 = vadd.f32 %v704_v26, %v320_v8 }
 0x10e   : > { %719 = vst [vmem:[%s244_s18 + $0x20] sm:$0xff] %v711_v27  ;;  %721 = vst [vmem:[%s244_s18 + $0x30] sm:$0xff] %v713_v28  ;;  %v712_v31 = vmax.f32 %v662_v29, 0.0  ;;  %v714_v32 = vmax.f32 %v705_v30, 0.0 }
 0x110   : > { %720 = vst [vmem:[%s244_s18 + $0x28] sm:$0xff] %v712_v31  ;;  %722 = vst [vmem:[%s244_s18 + $0x38] sm:$0xff] %v714_v32 }
 0x111 PF: > { %s13_s14 = sadd.s32 1, %s1050_s14   ;;  %s1286_s12 = smov %s1046_s13 }
 0x112   : > { %p10_p5 = scmp.ge.s32.totalorder %s13_s14, 4   ;;  %s1287_s13 = smov %s1289_s15 }
 0x114   :  { %12 = sbr.rel (!%p10_p5) target bundleno = 2 (0x2), region = 62 }

</bundles_post_ra>
